<compile_context>
chip_gen: v7x
topology: tpu7x:2x2x1
jax: 0.10.0
libtpu: 0.0.40
codegen_flags: <defaults>
</compile_context>

<pallas_src>
import jax
import jax.numpy as jnp
from jax.experimental import pallas as pl
from jax.experimental.pallas import tpu as pltpu


def _ortho_cp_kernel(qbd_ref, x_ref, o_ref):
    # One lane-dense MXU matmul per tile: [tile_m, 128] @ [128, 128] -> [tile_m, 128].
    # Loads and stores are both 128-lane dense; f32 accumulation on the MXU.
    o_ref[...] = jnp.dot(
        x_ref[...], qbd_ref[...], preferred_element_type=jnp.float32
    ).astype(o_ref.dtype)


def ortho_cp_forward(x, w, *, lane_width=128, max_tile_rows=8192):
    """x: [N, D] float32, w: [D, D] float32 parameter. Returns [N, D] = x @ Q^T."""
    N, D = x.shape
    assert w.shape == (D, D)
    # Block-diagonal trick needs D to divide the lane width (true for typical
    # patchdims like 16/32/64/128).
    # TODO(synk): for D not dividing 128, fall back to a padded-Q variant.
    assert lane_width % 128 == 0 and lane_width % D == 0
    copies = lane_width // D

    # ---- plain-JAX glue (tiny, one-off): Cayley-transform parameter ----
    # skew^T = -skew  =>  Q^T = inv(I+skew) @ (I-skew) = solve(I+skew, I-skew).
    # TODO(synk): matrix solve/inverse has no Pallas primitive; done in plain JAX.
    upper = jnp.triu(w, k=1)
    skew = upper - upper.T
    eye = jnp.eye(D, dtype=w.dtype)
    qt = jnp.linalg.solve(eye + skew, eye - skew)            # [D, D] == Q^T
    # Qbd = diag(Q^T, ..., Q^T): applying it to a [*, copies*D] row applies
    # Q^T independently to each consecutive D-wide chunk.
    qbd = jnp.kron(jnp.eye(copies, dtype=w.dtype), qt)       # [lane_width, lane_width]

    # ---- view x [N, D] as [n_rows, lane_width] (free row-major reshape) ----
    # Pad N only to the sublane granule of the reshaped view (8 * copies rows
    # of x), then size the tile so the last tile is full without big padding.
    n_rows = pl.cdiv(N, copies)                 # reshaped rows needed
    n_rows = pl.cdiv(n_rows, 8) * 8             # sublane granule
    # >=2 grid steps when there is enough work (uses both TCs on v7x);
    # otherwise a single step. Tile capped at max_tile_rows (~4 MiB/tile f32).
    num_tiles = max(pl.cdiv(n_rows, max_tile_rows), 2 if n_rows >= 16 else 1)
    tile_m = pl.cdiv(pl.cdiv(n_rows, num_tiles), 8) * 8
    n_rows = num_tiles * tile_m
    n_pad = n_rows * copies
    x_pad = x if n_pad == N else jnp.pad(x, ((0, n_pad - N), (0, 0)))
    x2 = x_pad.reshape(n_rows, lane_width)      # no transpose, no layout pass

    bytes_accessed = 4 * (2 * n_rows * lane_width + lane_width * lane_width)
    cost = pl.CostEstimate(
        flops=2 * n_rows * lane_width * lane_width,
        transcendentals=0,
        bytes_accessed=bytes_accessed,
    )

    out2 = pl.pallas_call(
        _ortho_cp_kernel,
        out_shape=jax.ShapeDtypeStruct((n_rows, lane_width), x.dtype),
        grid_spec=pltpu.PrefetchScalarGridSpec(
            num_scalar_prefetch=0,
            grid=(num_tiles,),
            in_specs=[
                pl.BlockSpec((lane_width, lane_width), lambda i: (0, 0)),  # Qbd, resident
                pl.BlockSpec((tile_m, lane_width), lambda i: (i, 0)),      # x tile
            ],
            out_specs=pl.BlockSpec((tile_m, lane_width), lambda i: (i, 0)),
        ),
        compiler_params=pltpu.CompilerParams(
            dimension_semantics=("parallel",),   # nothing grid-carried
            vmem_limit_bytes=32 * 1024 * 1024,   # safe on v7x's 64 MiB VMEM
        ),
        cost_estimate=cost,
    )(qbd, x2)

    # View back to [N, D]; padded rows (zeros) are trimmed.
    return out2.reshape(n_pad, D)[:N]


def ortho_cp_reference(x, w):
    upper = jnp.triu(w, k=1)
    skew = upper - upper.T
    eye = jnp.eye(w.shape[0], dtype=w.dtype)
    q = (eye + skew) @ jnp.linalg.inv(eye - skew)
    return (q @ x.T).T


if __name__ == "__main__":
    feature_dim = 32   # patchdim
    npatches = 128     # npatches

    key = jax.random.PRNGKey(0)
    kx, kw = jax.random.split(key)
    x = jax.random.normal(kx, (npatches, feature_dim), dtype=jnp.float32)
    # nn.Parameter(torch.zeros(D, D)) in the module; use small deterministic
    # random values instead so the Cayley transform is non-trivial.
    w = 0.1 * jax.random.normal(kw, (feature_dim, feature_dim), dtype=jnp.float32)

    out = jax.block_until_ready(ortho_cp_forward(x, w))
    ref = ortho_cp_reference(x, w)

    assert out.shape == (npatches, feature_dim)
    assert jnp.allclose(out, ref, atol=1e-4, rtol=1e-4)
    print("KERNEL_OK")
</pallas_src>

<mosaic_0001>
module attributes {stable_mosaic.version = 11 : i64} {
  func.func @_ortho_cp_kernel(%arg0: i32, %arg1: memref<128x128xf32, #tpu.memory_space<vmem>>, %arg2: memref<16x128xf32, #tpu.memory_space<vmem>>, %arg3: memref<16x128xf32, #tpu.memory_space<vmem>>) attributes {dimension_semantics = [#tpu.dimension_semantics<parallel>], iteration_bounds = array<i64: 2>, scalar_prefetch = 0 : i64, scratch_operands = 0 : i64, tpu.core_type = #tpu.core_type<tc>, window_params = [{pipeline_mode = #tpu.pipeline_mode<synchronous>, transform_indices = @transform_0, window_bounds = array<i64: 128, 128>}, {transform_indices = @transform_1, window_bounds = array<i64: 16, 128>}, {transform_indices = @transform_2, window_bounds = array<i64: 16, 128>}]} {
    %c0 = arith.constant 0 : index
    %c0_0 = arith.constant 0 : index
    %0 = vector.load %arg2[%c0, %c0_0] : memref<16x128xf32, #tpu.memory_space<vmem>>, vector<16x128xf32>
    %c0_1 = arith.constant 0 : index
    %c0_2 = arith.constant 0 : index
    %1 = vector.load %arg1[%c0_1, %c0_2] : memref<128x128xf32, #tpu.memory_space<vmem>>, vector<128x128xf32>
    %cst = arith.constant dense<0.000000e+00> : vector<16x128xf32>
    %2 = tpu.matmul %0, %1, %cst {dimension_numbers = #tpu.dot_dimension_numbers<[1], [0], [0], [1], [0, 0, 1, 1], [], []>} : vector<16x128xf32>, vector<128x128xf32>, vector<16x128xf32> -> vector<16x128xf32>
    %c0_3 = arith.constant 0 : index
    %c0_4 = arith.constant 0 : index
    %3 = vector.load %arg3[%c0_3, %c0_4] : memref<16x128xf32, #tpu.memory_space<vmem>>, vector<16x128xf32>
    tpu.vector_store %arg3[%c0_3, %c0_4], %2 {strides = array<i32>} : memref<16x128xf32, #tpu.memory_space<vmem>>, vector<16x128xf32>,
    return
  }
  func.func @transform_0(%arg0: i32) -> (i32, i32) {
    %c0_i32 = arith.constant 0 : i32
    %c0_i32_0 = arith.constant 0 : i32
    %c0_i32_1 = arith.constant 0 : i32
    return %c0_i32, %c0_i32_0 : i32, i32
  }
  func.func @transform_1(%arg0: i32) -> (i32, i32) {
    %c0_i32 = arith.constant 0 : i32
    %c0_i32_0 = arith.constant 0 : i32
    return %arg0, %c0_i32 : i32, i32
  }
  func.func @transform_2(%arg0: i32) -> (i32, i32) {
    %c0_i32 = arith.constant 0 : i32
    %c0_i32_0 = arith.constant 0 : i32
    return %arg0, %c0_i32 : i32, i32
  }
}

</mosaic_0001>

<bundles_post_ra>
// kernel: tpu_custom_call.1
= control target key start
LH: loop header
LB: loop body
LE: loop exit
PB: predicated region body
PF: predicated region fallthrough
CT: control target
= control target key end

     0   :  { %7 = vsyncpa [#allocation3], 0  ;;  %s904_s0 = inlined_call_operand.hbm [shape: f32[128,128], index: 0, kind: input, shape index: {}]   ;;  %s905_s1 = inlined_call_operand.hbm [shape: f32[32,128], index: 1, kind: input, shape index: {}]   ;;  %s906_s2 = inlined_call_operand.hbm [shape: f32[32,128], index: 2, kind: output, shape index: {}]  }
   0x1   :  { %8 = vsyncpa [#allocation6], 0 }
   0x2   :  { %10 = vsyncpa [#allocation6 + $0x1], 0 }
   0x3   :  { %11 = vsyncpa [#allocation4], 0 }
   0x4   :  { %13 = vsyncpa [#allocation4 + $0x1], 0  ;;  %s689_s9 = smov 0   ;;  %s691_s10 = smov 0  }
   0x5   :  { %s693_s11 = smov 0   ;;  %s695_s12 = smov 0  }
   0x6 LB: > { %s710_s13 = sadd.s32 4294967295, %s665_s12   ;;  %s373_s14 = sadd.s32 4294967294, %s665_s12   ;;  %s665_s12 = sphi %s695_s12, %s926_s12   ;;  %s661_s11 = sphi %s693_s11, %s925_s11   ;;  %s657_s10 = sphi %s691_s10, %s924_s10   ;;  %s653_s9 = sphi %s689_s9, %s923_s9  }
   0x7   : > { %p60_p0 = scmp.ne.s32.totalorder %s657_s10, %s653_s9  ;;  %p907_p1 = scmp.eq.s32.totalorder %s710_s13, 0 }
   0x8   : > { %p90_p3 = scmp.eq.s32.totalorder %s373_s14, 1  ;;  %p374_p5 = scmp.ge.s32.totalorder %s665_s12, 1 }
   0x9   : > { %p719_p4 = por %p907_p1, %p60_p0  ;;  %p97_p7 = scmp.lt.s32.totalorder %s665_s12, 3 }
   0xa   : > { %p724_p6 = por %p90_p3, %p60_p0  ;;  %s667_s18 = smov [#allocation2]  }
   0xb   : > { %s910_s15 = scalar_select %p719_p4, 1, 0 }
   0xc   : > { %s911_s16 = scalar_select %p724_p6, 1, 0 }
   0xd   : > { %p729_p8 = pnand %p374_p5, %p97_p7  ;;  %s109_s19 = sshll.u32 %s667_s18, 4  ;;  %s733_s19 = int_to_ptr.vmem [resolvable:$true] %s109_s19 }
   0xe   : > { %s745_s21 = sadd.s32 1, %s665_s12   ;;  %s47_s22 = sadd.s32 1, %s661_s11 }
   0xf   : > { %s912_s17 = scalar_select %p729_p8, 1, 0 }
  0x10   : > { %p484_p9 = pneg %p729_p8  ;;  %s44_s23 = ssub.s32 %s665_s12, %s745_s21 }
  0x11   : > { %s537_s26 = scalar_lea.hbm %s904_s0, 2048 }
  0x12   : > { %p740_p11 = pnand %p484_p9, %p907_p1  ;;  %p538_p12 = scmp.ne.s32.totalorder %s904_s0, %s537_s26 }
  0x13   : > { %p544_p5 = scmp.lt.u32.totalorder %s537_s26, %s904_s0 }
  0x14   : > { %p539_p13 = pneg %p740_p11 }
  0x16   : > { %p540_p0 = pnand %p539_p13, %p538_p12 }
  0x18   : > { %p541_p3 = pneg %p540_p0 }
  0x1a   : > { %p546_p7 = pnand %p544_p5, %p541_p3 }
  0x1c   : > { %549 = shalt.err (!%p546_p7)
}
  0x1d   : > { %s550_s3 = scalar_lea.vmem %s733_s19, 2048  ;;  %p558_p2 = scmp.lt.s32.totalorder %s733_s19, %s733_s19 }
  0x1e   : > { %p551_p9 = scmp.ne.s32.totalorder %s733_s19, %s550_s3  ;;  %p559_p6 = scmp.lt.s32.totalorder %s550_s3, %s550_s3 }
  0x20   : > { %p553_p10 = pnand %p551_p9, %p539_p13  ;;  %p560_p4 = por %p559_p6, %p558_p2 }
  0x22   : > { %p554_p1 = pneg %p553_p10 }
  0x24   : > { %p561_p8 = pnand %p560_p4, %p554_p1 }
  0x26   : > { %564 = shalt.err (!%p561_p8)
}
  0x27   : > { %s668_s4 = smov 128   ;;  %s669_s5 = smov 8  }
  0x28   : > { %487 = dma.hbm_to_vmem [thread:$0]  (!%p740_p11), %s904_s0, 2048, %s733_s19, [#allocation3], %s668_s4, %s668_s4, %s669_s5  }
  0x29   : > { %p45_p1 = scmp.eq.s32.totalorder %s44_s23, 0  ;;  %p54_p2 = scmp.ne.s32.totalorder %s661_s11, %s657_s10 }
  0x2a   : > { %p55_p4 = scmp.eq.s32.totalorder %s665_s12, 0  ;;  %p497_p6 = scmp.lt.s32.totalorder %s665_s12, 2 }
  0x2b   : > { %s779_s8 = scalar_select %p45_p1, %s661_s11, %s47_s22  }
  0x2c   : > { %p56_p8 = por %p55_p4, %p54_p2  ;;  %p914_p10 = scmp.eq.s32.totalorder %s710_s13, 1 }
  0x2d   : > { %s123_s18 = sand.u32 1, %s661_s11   ;;  %s389_s20 = sshll.u32 %s665_s12, 8 }
  0x2e   : > { %p783_p12 = por %p914_p10, %p54_p2  ;;  %s377_s24 = sshll.u32 %s123_s18, 4 }
  0x2f   : > { %s792_s27 = scalar_lea.hbm %s905_s1, %s389_s20  ;;  %s127_s19 = scalar_lea.vmem [#allocation5], %s377_s24 }
  0x30   : > { %s134_s22 = sshll.u32 %s127_s19, 4  ;;  %p794_p11 = pnand %p497_p6, %p56_p8  ;;  %s798_s22 = int_to_ptr.vmem [resolvable:$true] %s134_s22 }
  0x31   : > { %s800_s28 = scalar_lea.sflag [#allocation6], %s123_s18  ;;  %s565_s29 = scalar_lea.hbm %s792_s27, 256 }
  0x32   : > { %p566_p13 = scmp.ne.s32.totalorder %s792_s27, %s565_s29  ;;  %p567_p0 = pneg %p794_p11 }
  0x33   : > { %s570_s6 = scalar_lea.hbm %s905_s1, 512  ;;  %p571_p7 = scmp.lt.u32.totalorder %s792_s27, %s905_s1 }
  0x34   : > { %p568_p3 = pnand %p567_p0, %p566_p13  ;;  %p572_p9 = scmp.lt.u32.totalorder %s570_s6, %s565_s29 }
  0x35   : > { %p574_p2 = scmp.lt.u32.totalorder %s565_s29, %s792_s27 }
  0x36   : > { %p569_p5 = pneg %p568_p3  ;;  %p573_p1 = por %p572_p9, %p571_p7 }
  0x38   : > { %p575_p4 = por %p574_p2, %p573_p1 }
  0x3a   : > { %p576_p6 = pnand %p575_p4, %p569_p5 }
  0x3c   : > { %579 = shalt.err (!%p576_p6)
}
  0x3d   : > { %s580_s18 = scalar_lea.vmem %s798_s22, 256  ;;  %s670_s24 = smov [#allocation5]  }
  0x3e   : > { %p581_p8 = scmp.ne.s32.totalorder %s798_s22, %s580_s18  ;;  %s585_s25 = sshll.u32 %s670_s24, 4  ;;  %s586_s25 = int_to_ptr.vmem [resolvable:$false] %s585_s25 }
  0x3f   : > { %s587_s26 = scalar_lea.vmem %s586_s25, 512  ;;  %p588_p3 = scmp.lt.s32.totalorder %s798_s22, %s586_s25 }
  0x40   : > { %p583_p10 = pnand %p581_p8, %p567_p0  ;;  %p589_p7 = scmp.lt.s32.totalorder %s587_s26, %s580_s18 }
  0x42   : > { %p584_p13 = pneg %p583_p10  ;;  %p590_p9 = por %p589_p7, %p588_p3 }
  0x44   : > { %p591_p1 = pnand %p590_p9, %p584_p13 }
  0x46   : > { %594 = shalt.err (!%p591_p1)
}
  0x47   : > { %491 = dma.hbm_to_vmem [thread:$0]  (!%p794_p11), %s792_s27, 256, %s798_s22, %s800_s28, %s668_s4, %s668_s4, %s669_s5  }
  0x48   : > { %p917_p0 = scmp.ne.s32.totalorder %s912_s17, 0 }
  0x49   : > { %p918_p5 = scmp.eq.s32.totalorder (!%p917_p0), %s710_s13, 0 }
  0x4a   : > { %146 = sbr.rel (%p917_p0) target bundleno = 349 (0x15d), region = 28 }
  0x51   : > { %640 = dma.done.wait (%p918_p5), [#allocation3], 2048   ;;  %p919_p2 = pmov %p918_p5 }
  0x52   : > { %s838_s19 = sand.u32 1, %s657_s10   ;;  %p920_p11 = scmp.ne.s32.totalorder %s910_s15, 0 }
  0x53   : > { %642 = vsyncadd (%p919_p2), [#allocation3], 4294965248  ;;  %s382_s23 = sshll.u32 %s838_s19, 4  ;;  %s153_s29 = scalar_lea.sflag [#allocation6], %s838_s19 }
  0x54   : > { %s844_s4 = scalar_lea.vmem [#allocation5], %s382_s23 }
  0x55   : > { %644 = dma.done.wait (%p920_p11), %s153_s29, 256  }
  0x56   : > { %646 = vsyncadd (%p920_p11), %s153_s29, 4294967040  ;;  %v181_v0 = vld [vmem:[#allocation2] sm:$0xff]  ;;  %v182_v1 = vld [vmem:[#allocation2 + $0x8] sm:$0xff]  ;;  %s176_s15 = scalar_lea.vmem [#allocation7], %s382_s23  ;;  %s390_s5 = sshll.u32 %s710_s13, 8 }
  0x57   : > { %v183_v2 = vld [vmem:[#allocation2 + $0x10] sm:$0xff]  ;;  %v444_v3 = vpack.c.bf16 %v182_v1, %v181_v0  ;;  %v184_v4 = vld [vmem:[#allocation2 + $0x18] sm:$0xff]  ;;  %v185_v6 = vld [vmem:[#allocation2 + $0x20] sm:$0xff]  ;;  %s288_s17 = sshll.u32 %s176_s15, 4  ;;  %s860_s28 = scalar_lea.hbm %s906_s2, %s390_s5  ;;  %s855_s17 = int_to_ptr.vmem [resolvable:$true] %s288_s17 }
  0x58   : > { %v448_v5 = vpack.c.bf16 %v184_v4, %v183_v2  ;;  %v186_v7 = vld [vmem:[#allocation2 + $0x28] sm:$0xff]  ;;  %v179_v9 = vld [vmem:[%s844_s4] sm:$0xff]  ;;  %v188_v11 = vld [vmem:[#allocation2 + $0x38] sm:$0xff]  ;;  %s275_s30 = scalar_lea.sflag [#allocation4], %s838_s19  ;;  %s595_s3 = scalar_lea.vmem %s855_s17, 256 }
  0x59   : > { %445 = vmatprep.subr.bf16.mxu0 %v444_v3  ;;  %v452_v8 = vpack.c.bf16 %v186_v7, %v185_v6  ;;  %v187_v10 = vld [vmem:[#allocation2 + $0x30] sm:$0xff]  ;;  %441 = vmatprep.mubr.f32.mxu0 %v179_v9  ;;  %v189_v13 = vld [vmem:[#allocation2 + $0x40] sm:$0xff]  ;;  %v190_v14 = vld [vmem:[#allocation2 + $0x48] sm:$0xff]  ;;  %p596_p4 = scmp.ne.s32.totalorder %s855_s17, %s595_s3  ;;  %s671_s13 = smov [#allocation7]  }
  0x5a   : > { %447 = vmatpush3.bf16.msra.mxu0 %v444_v3  ;;  %v456_v12 = vpack.c.bf16 %v188_v11, %v187_v10  ;;  %v460_v15 = vpack.c.bf16 %v190_v14, %v189_v13  ;;  %v191_v16 = vld [vmem:[#allocation2 + $0x50] sm:$0xff]  ;;  %v192_v17 = vld [vmem:[#allocation2 + $0x58] sm:$0xff]  ;;  %v193_v19 = vld [vmem:[#allocation2 + $0x60] sm:$0xff]  ;;  %s599_s6 = sshll.u32 %s671_s13, 4  ;;  %s600_s6 = int_to_ptr.vmem [resolvable:$false] %s599_s6 }
  0x5b   : > { %449 = vmatprep.subr.bf16.mxu0 %v448_v5  ;;  %v464_v18 = vpack.c.bf16 %v192_v17, %v191_v16  ;;  %v194_v20 = vld [vmem:[#allocation2 + $0x68] sm:$0xff]  ;;  %v195_v22 = vld [vmem:[#allocation2 + $0x70] sm:$0xff]  ;;  %v196_v23 = vld [vmem:[#allocation2 + $0x78] sm:$0xff]  ;;  %p597_p6 = pnand %p596_p4, %p783_p12  ;;  %s601_s7 = scalar_lea.vmem %s600_s6, 512 }
  0x5c   : > { %v468_v21 = vpack.c.bf16 %v194_v20, %v193_v19  ;;  %v472_v24 = vpack.c.bf16 %v196_v23, %v195_v22  ;;  %v180_v25 = vld [vmem:[%s844_s4 + $0x8] sm:$0xff]  ;;  %p602_p10 = scmp.lt.s32.totalorder %s855_s17, %s600_s6  ;;  %p603_p13 = scmp.lt.s32.totalorder %s601_s7, %s595_s3 }
  0x5d   : > { %p598_p8 = pneg %p597_p6 }
  0x5e   : > { %451 = vmatpush3.bf16.msra.mxu0 %v448_v5  ;;  %p604_p3 = por %p603_p13, %p602_p10 }
  0x5f   : > { %453 = vmatprep.subr.bf16.mxu0 %v452_v8 }
  0x60   : > { %p605_p7 = pnand %p604_p3, %p598_p8 }
  0x62   : > { %455 = vmatpush3.bf16.msra.mxu0 %v452_v8 }
  0x63   : > { %457 = vmatprep.subr.bf16.mxu0 %v456_v12 }
  0x66   : > { %459 = vmatpush3.bf16.msra.mxu0 %v456_v12 }
  0x67   : > { %461 = vmatprep.subr.bf16.mxu0 %v460_v15 }
  0x6a   : > { %463 = vmatpush3.bf16.msra.mxu0 %v460_v15 }
  0x6b   : > { %465 = vmatprep.subr.bf16.mxu0 %v464_v18 }
  0x6e   : > { %467 = vmatpush3.bf16.msra.mxu0 %v464_v18 }
  0x6f   : > { %469 = vmatprep.subr.bf16.mxu0 %v468_v21 }
  0x72   : > { %471 = vmatpush3.bf16.msra.mxu0 %v468_v21 }
  0x73   : > { %473 = vmatprep.subr.bf16.mxu0 %v472_v24 }
  0x76   : > { %475 = vmatpush3.bf16.msra.mxu0 %v472_v24 }
  0x79   : > { %442 = vmatmul.mubr.f32.vlgmr.msra.gmra.mrb[0].mxu0 %v180_v25 }
 0x14c   : > { %v443_v26 = vpop.f32.mrb[0].mxu0 }
 0x14d   : > { %273 = vst [vmem:[%s176_s15 + $0x8] sm:$0xff] %v443_v26  ;;  %v263_v27 = vpop.f32.mrb[1].mxu0 }
 0x14e   : > { %272 = vst [vmem:[%s176_s15] sm:$0xff] %v263_v27 }
 0x14f   : > { %608 = shalt.err (!%p605_p7)
}
 0x150   : > { %s609_s20 = scalar_lea.hbm %s860_s28, 256  ;;  %s613_s25 = scalar_lea.hbm %s906_s2, 512 }
 0x151   : > { %p610_p9 = scmp.ne.s32.totalorder %s860_s28, %s609_s20  ;;  %p614_p5 = scmp.lt.u32.totalorder %s860_s28, %s906_s2 }
 0x152   : > { %p615_p2 = scmp.lt.u32.totalorder %s613_s25, %s609_s20  ;;  %p617_p4 = scmp.lt.u32.totalorder %s609_s20, %s860_s28 }
 0x153   : > { %p611_p1 = pnand %p610_p9, %p783_p12 }
 0x154   : > { %p616_p11 = por %p615_p2, %p614_p5 }
 0x155   : > { %p612_p0 = pneg %p611_p1 }
 0x156   : > { %p618_p6 = por %p617_p4, %p616_p11 }
 0x158   : > { %p619_p8 = pnand %p618_p6, %p612_p0 }
 0x15a   : > { %622 = shalt.err (!%p619_p8)
}
 0x15b   : > { %s672_s29 = smov 128   ;;  %s673_s4 = smov 8  }
 0x15c   : > { %482 = dma.vmem_to_hbm [thread:$0]  (%p783_p12), %s855_s17, 256, %s860_s28, %s275_s30, %s672_s29, %s672_s29, %s673_s4  }
 0x15d PF: > { %s303_s15 = sand.u32 1, %s653_s9   ;;  %p921_p10 = scmp.ne.s32.totalorder %s911_s16, 0 }
 0x15e   : > { %p922_p13 = scmp.ge.s32.totalorder %s665_s12, 2  ;;  %s304_s5 = scalar_lea.sflag [#allocation4], %s303_s15 }
 0x160   : > { %p493_p3 = pnand %p922_p13, %p921_p10 }
 0x162   : > { %648 = dma.done.wait (!%p493_p3), %s304_s5, 256  }
 0x163   : > { %650 = vsyncadd (!%p493_p3), %s304_s5, 4294967040  ;;  %p16_p7 = scmp.ge.s32.totalorder %s745_s21, 4   ;;  %s923_s9 = smov %s657_s10 }
 0x164   : > { %s924_s10 = smov %s661_s11  ;;  %s925_s11 = smov %s779_s8 }
 0x165   : > { %s926_s12 = smov %s745_s21  ;;  %18 = sbr.rel (!%p16_p7) target bundleno = 6 (0x6), region = 78 }
 0x16c   :  { %309 = vsyncpa [#allocation3], 1 }
 0x16d   :  { %311 = vsyncpa [#allocation3 + $0x1], 1 }
 0x16e   :  { %312 = vsyncpa [#allocation6], 1 }
 0x16f   :  { %314 = vsyncpa [#allocation6 + $0x1], 1 }
 0x170   :  { %315 = vsyncpa [#allocation4], 1 }
 0x171   :  { %317 = vsyncpa [#allocation4 + $0x1], 1 }

</bundles_post_ra>
